<compile_context>
chip_gen: v5e
topology: v5e:2x2
jax: 0.10.0
libtpu: 0.0.40
codegen_flags: <defaults>
</compile_context>

<pallas_src>
import math

import jax
import jax.numpy as jnp
from jax import lax
from jax.experimental import pallas as pl
from jax.experimental.pallas import tpu as pltpu


def _round_up(a, b):
    return (a + b - 1) // b * b


def _linear_kernel(x_ref, w_ref, b_ref, o_ref):
    # x_ref: (tm, P)  compute dtype
    # w_ref: (E, P)   compute dtype (native nn.Linear layout, no host transpose)
    # b_ref: (1, E)   f32
    # o_ref: (tm, E)  output dtype
    acc = lax.dot_general(
        x_ref[...],
        w_ref[...],
        dimension_numbers=(((1,), (1,)), ((), ())),   # contract over P
        preferred_element_type=jnp.float32,
    )
    o_ref[...] = (acc + b_ref[...]).astype(o_ref.dtype)


def superpixel_pad_embed(x, weight, bias, *, tm=512, compute_dtype=None):
    """x: (B, S, P), weight: (E, P), bias: (E,) -> (B, S, E).

    compute_dtype: optional dtype (e.g. jnp.bfloat16) for x/weight on the way
    into the MXU; accumulation stays f32 and the output keeps x.dtype.
    """
    B, S, P = x.shape
    E = weight.shape[0]
    M = B * S

    out_dtype = x.dtype
    cdt = compute_dtype if compute_dtype is not None else x.dtype

    # ---- choose row tile -------------------------------------------------
    # At least 8 (sublane), at most the (8-rounded) row count.
    tm = max(8, min(int(tm), _round_up(M, 8)))

    # Conservative VMEM budget so the tile also fits v7x (64 MiB physical,
    # 32 MiB scoped default) with headroom, including double buffering.
    in_bytes = jnp.dtype(cdt).itemsize
    out_bytes = jnp.dtype(out_dtype).itemsize
    VMEM_CAP = 24 * 1024 * 1024

    def _budget(t):
        return (2 * t * P * in_bytes          # double-buffered x tiles
                + 2 * t * E * out_bytes       # double-buffered out tiles
                + 2 * E * P * in_bytes        # weight (constant index map)
                + 2 * E * 4)                  # bias

    while tm > 8 and _budget(tm) > VMEM_CAP:
        tm = max(8, _round_up(tm // 2, 8))

    # ---- pad rows instead of asserting divisibility ------------------------
    M_pad = _round_up(M, tm)
    x2d = x.reshape(M, P).astype(cdt)
    if M_pad != M:
        x2d = jnp.pad(x2d, ((0, M_pad - M), (0, 0)))

    w = weight.astype(cdt)                    # keep (E, P); no .T materialized
    b2d = bias.reshape(1, E).astype(jnp.float32)

    grid = (M_pad // tm,)

    out2d = pl.pallas_call(
        _linear_kernel,
        out_shape=jax.ShapeDtypeStruct((M_pad, E), out_dtype),
        grid_spec=pltpu.PrefetchScalarGridSpec(
            num_scalar_prefetch=0,
            grid=grid,
            in_specs=[
                pl.BlockSpec((tm, P), lambda i: (i, 0)),
                pl.BlockSpec((E, P), lambda i: (0, 0)),
                pl.BlockSpec((1, E), lambda i: (0, 0)),
            ],
            out_specs=pl.BlockSpec((tm, E), lambda i: (i, 0)),
        ),
        compiler_params=pltpu.CompilerParams(
            dimension_semantics=("parallel",),
        ),
    )(x2d, w, b2d)

    if M_pad != M:
        out2d = out2d[:M]

    # self.norm is nn.Identity() (norm_layer=None default) -> no-op
    return out2d.reshape(B, S, E)


if __name__ == "__main__":
    # Small, forward-consistent shapes (embed_dim chosen lane-dense = 128).
    batch = 2
    superpixels = 8      # S
    patch_dim = 128      # padded per-superpixel feature length (seg.size()[1])
    embed_dim = 128      # E

    key = jax.random.PRNGKey(0)
    kx, kw, kb, kx2 = jax.random.split(key, 4)

    # Padded superpixel features (what _create_segments + padding would emit).
    x = jax.random.normal(kx, (batch, superpixels, patch_dim), dtype=jnp.float32)

    # Deterministic nn.Linear-style init: U(-1/sqrt(in), 1/sqrt(in))
    bound = 1.0 / math.sqrt(patch_dim)
    weight = jax.random.uniform(
        kw, (embed_dim, patch_dim), minval=-bound, maxval=bound, dtype=jnp.float32
    )
    bias = jax.random.uniform(
        kb, (embed_dim,), minval=-bound, maxval=bound, dtype=jnp.float32
    )

    ref = jnp.einsum("bsp,ep->bse", x, weight) + bias

    # 1) f32 path (tight tolerance).
    out = jax.block_until_ready(superpixel_pad_embed(x, weight, bias))
    assert out.shape == (batch, superpixels, embed_dim)
    assert jnp.allclose(out, ref, atol=1e-5, rtol=1e-5)

    # 2) bf16-input path (halves HBM read traffic; f32 accumulation).
    out_bf16 = jax.block_until_ready(
        superpixel_pad_embed(x, weight, bias, compute_dtype=jnp.bfloat16)
    )
    assert jnp.allclose(out_bf16, ref, atol=5e-2, rtol=5e-2)

    # 3) larger, non-divisible row count: exercises tail padding + multi-step
    #    grid (2 steps with tm=512 -> both TCs on v7x).
    B2, S2 = 4, 250      # M = 1000 -> padded to 1024, tm = 512, grid = (2,)
    x_big = jax.random.normal(kx2, (B2, S2, patch_dim), dtype=jnp.float32)
    out_big = jax.block_until_ready(superpixel_pad_embed(x_big, weight, bias))
    ref_big = jnp.einsum("bsp,ep->bse", x_big, weight) + bias
    assert out_big.shape == (B2, S2, embed_dim)
    assert jnp.allclose(out_big, ref_big, atol=1e-5, rtol=1e-5)

    print("KERNEL_OK")
</pallas_src>

<mosaic_0001>
module attributes {stable_mosaic.version = 11 : i64} {
  func.func @_linear_kernel(%arg0: i32, %arg1: memref<16x128xf32, #tpu.memory_space<vmem>>, %arg2: memref<128x128xf32, #tpu.memory_space<vmem>>, %arg3: memref<1x128xf32, #tpu.memory_space<vmem>>, %arg4: memref<16x128xf32, #tpu.memory_space<vmem>>) attributes {dimension_semantics = [#tpu.dimension_semantics<parallel>], iteration_bounds = array<i64: 1>, scalar_prefetch = 0 : i64, scratch_operands = 0 : i64, tpu.core_type = #tpu.core_type<tc>, window_params = [{transform_indices = @transform_0, window_bounds = array<i64: 16, 128>}, {pipeline_mode = #tpu.pipeline_mode<synchronous>, transform_indices = @transform_1, window_bounds = array<i64: 128, 128>}, {pipeline_mode = #tpu.pipeline_mode<synchronous>, transform_indices = @transform_2, window_bounds = array<i64: 1, 128>}, {transform_indices = @transform_3, window_bounds = array<i64: 16, 128>}]} {
    %c0 = arith.constant 0 : index
    %c0_0 = arith.constant 0 : index
    %0 = vector.load %arg1[%c0, %c0_0] : memref<16x128xf32, #tpu.memory_space<vmem>>, vector<16x128xf32>
    %c0_1 = arith.constant 0 : index
    %c0_2 = arith.constant 0 : index
    %1 = vector.load %arg2[%c0_1, %c0_2] : memref<128x128xf32, #tpu.memory_space<vmem>>, vector<128x128xf32>
    %cst = arith.constant dense<0.000000e+00> : vector<16x128xf32>
    %2 = tpu.matmul %0, %1, %cst {dimension_numbers = #tpu.dot_dimension_numbers<[1], [1], [0], [0], [0, 0, 1, 0], [], []>} : vector<16x128xf32>, vector<128x128xf32>, vector<16x128xf32> -> vector<16x128xf32>
    %c0_3 = arith.constant 0 : index
    %c0_4 = arith.constant 0 : index
    %3 = vector.load %arg3[%c0_3, %c0_4] : memref<1x128xf32, #tpu.memory_space<vmem>>, vector<1x128xf32>
    %4 = vector.broadcast %3 : vector<1x128xf32> to vector<16x128xf32>
    %5 = arith.addf %2, %4 : vector<16x128xf32>
    %c0_5 = arith.constant 0 : index
    %c0_6 = arith.constant 0 : index
    %6 = vector.load %arg4[%c0_5, %c0_6] : memref<16x128xf32, #tpu.memory_space<vmem>>, vector<16x128xf32>
    tpu.vector_store %arg4[%c0_5, %c0_6], %5 {strides = array<i32>} : memref<16x128xf32, #tpu.memory_space<vmem>>, vector<16x128xf32>,
    return
  }
  func.func @transform_0(%arg0: i32) -> (i32, i32) {
    %c0_i32 = arith.constant 0 : i32
    %c0_i32_0 = arith.constant 0 : i32
    return %arg0, %c0_i32 : i32, i32
  }
  func.func @transform_1(%arg0: i32) -> (i32, i32) {
    %c0_i32 = arith.constant 0 : i32
    %c0_i32_0 = arith.constant 0 : i32
    %c0_i32_1 = arith.constant 0 : i32
    return %c0_i32, %c0_i32_0 : i32, i32
  }
  func.func @transform_2(%arg0: i32) -> (i32, i32) {
    %c0_i32 = arith.constant 0 : i32
    %c0_i32_0 = arith.constant 0 : i32
    %c0_i32_1 = arith.constant 0 : i32
    return %c0_i32, %c0_i32_0 : i32, i32
  }
  func.func @transform_3(%arg0: i32) -> (i32, i32) {
    %c0_i32 = arith.constant 0 : i32
    %c0_i32_0 = arith.constant 0 : i32
    return %arg0, %c0_i32 : i32, i32
  }
}

</mosaic_0001>

<bundles_post_ra>
// kernel: tpu_custom_call.1
= control target key start
LH: loop header
LB: loop body
LE: loop exit
PB: predicated region body
PF: predicated region fallthrough
CT: control target
= control target key end

     0   :  { %8 = vsyncpa [#allocation3], 0  ;;  %s260_s0 = inlined_call_operand.hbm [shape: f32[16,128], index: 0, kind: input, shape index: {}]   ;;  %s261_s1 = inlined_call_operand.hbm [shape: f32[128,128], index: 1, kind: input, shape index: {}]   ;;  %s262_s2 = inlined_call_operand.vmem [shape: f32[1,128], index: 2, kind: input, shape index: {}]   ;;  %s263_s3 = inlined_call_operand.hbm [shape: f32[16,128], index: 3, kind: output, shape index: {}]  }
   0x1   :  { %9 = vsyncpa [#allocation6], 0 }
   0x2   :  { %10 = vsyncpa [#allocation4], 0  ;;  %s15_s14 = sshll.u32 %s260_s0, 4  ;;  %s214_s15 = smov [#allocation2]   ;;  %s16_s14 = int_to_ptr.hbm [resolvable:$true] %s15_s14 }
   0x3   :  { %s17_s16 = sshll.u32 %s214_s15, 4  ;;  %s28_s19 = sshll.u32 %s261_s1, 4  ;;  %s18_s16 = int_to_ptr.vmem [resolvable:$true] %s17_s16  ;;  %s29_s19 = int_to_ptr.hbm [resolvable:$true] %s28_s19 }
   0x4   :  { %s215_s20 = smov 128   ;;  %s216_s21 = smov 8  }
   0x5   :  { %23 = dma.hbm_to_vmem [thread:$0]  %s16_s14, 256, %s18_s16, [#allocation3], %s215_s20, %s215_s20, %s216_s21  }
   0x6   :  { %s217_s22 = smov [#allocation5]  }
   0x7   :  { %s30_s23 = sshll.u32 %s217_s22, 4  ;;  %s31_s23 = int_to_ptr.vmem [resolvable:$true] %s30_s23 }
   0x8   :  { %36 = dma.hbm_to_vmem [thread:$0]  %s29_s19, 2048, %s31_s23, [#allocation6], %s215_s20, %s215_s20, %s216_s21  }
   0x9   :  { %208 = dma.done.wait [#allocation3], 256  }
   0xa   :  { %209 = vsyncadd [#allocation3], 4294967040 }
   0xb   :  { %210 = dma.done.wait [#allocation6], 2048  }
   0xc   :  { %211 = vsyncadd [#allocation6], 4294965248  ;;  %v64_v0 = vld [vmem:[#allocation5 + $0x78] sm:$0xff]  ;;  %v63_v1 = vld [vmem:[#allocation5 + $0x70] sm:$0xff]  ;;  %s218_s24 = smov [#allocation7]   ;;  %s100_s28 = sshll.u32 %s263_s3, 4  ;;  %s101_s28 = int_to_ptr.hbm [resolvable:$true] %s100_s28 }
   0xd   :  { %69 = vmatpush.xpose.msra.mxu0 %v64_v0  ;;  %114 = vmatpush.xpose.msra.mxu1 %v64_v0  ;;  %v62_v2 = vld [vmem:[#allocation5 + $0x68] sm:$0xff]  ;;  %v61_v3 = vld [vmem:[#allocation5 + $0x60] sm:$0xff]  ;;  %v60_v4 = vld [vmem:[#allocation5 + $0x58] sm:$0xff]  ;;  %s98_s25 = sshll.u32 %s218_s24, 4  ;;  %s99_s25 = int_to_ptr.vmem [resolvable:$true] %s98_s25 }
   0xe   :  { %v59_v5 = vld [vmem:[#allocation5 + $0x50] sm:$0xff]  ;;  %v58_v6 = vld [vmem:[#allocation5 + $0x48] sm:$0xff]  ;;  %v57_v7 = vld [vmem:[#allocation5 + $0x40] sm:$0xff] }
   0xf   :  { %v56_v8 = vld [vmem:[#allocation5 + $0x38] sm:$0xff]  ;;  %v55_v9 = vld [vmem:[#allocation5 + $0x30] sm:$0xff]  ;;  %v54_v10 = vld [vmem:[#allocation5 + $0x28] sm:$0xff] }
  0x10   :  { %v53_v11 = vld [vmem:[#allocation5 + $0x20] sm:$0xff]  ;;  %v52_v12 = vld [vmem:[#allocation5 + $0x18] sm:$0xff]  ;;  %v51_v13 = vld [vmem:[#allocation5 + $0x10] sm:$0xff] }
  0x11   :  { %70 = vmatpush.xpose.msra.mxu0 %v63_v1  ;;  %115 = vmatpush.xpose.msra.mxu1 %v63_v1  ;;  %v50_v14 = vld [vmem:[#allocation5 + $0x8] sm:$0xff]  ;;  %v49_v15 = vld [vmem:[#allocation5] sm:$0xff]  ;;  %v47_v16 = vld [vmem:[#allocation2] sm:$0xff] }
  0x12   :  { %v48_v17 = vld [vmem:[#allocation2 + $0x8] sm:$0xff]  ;;  %v135_v18 = vld [vmem:[%s262_s2] ss:$0 sm:$0xff] }
  0x15   :  { %71 = vmatpush.xpose.msra.mxu0 %v62_v2  ;;  %116 = vmatpush.xpose.msra.mxu1 %v62_v2 }
  0x19   :  { %72 = vmatpush.xpose.msra.mxu0 %v61_v3  ;;  %117 = vmatpush.xpose.msra.mxu1 %v61_v3 }
  0x1d   :  { %73 = vmatpush.xpose.msra.mxu0 %v60_v4  ;;  %118 = vmatpush.xpose.msra.mxu1 %v60_v4 }
  0x21   :  { %74 = vmatpush.xpose.msra.mxu0 %v59_v5  ;;  %119 = vmatpush.xpose.msra.mxu1 %v59_v5 }
  0x25   :  { %75 = vmatpush.xpose.msra.mxu0 %v58_v6  ;;  %120 = vmatpush.xpose.msra.mxu1 %v58_v6 }
  0x29   :  { %76 = vmatpush.xpose.msra.mxu0 %v57_v7  ;;  %121 = vmatpush.xpose.msra.mxu1 %v57_v7 }
  0x2d   :  { %77 = vmatpush.xpose.msra.mxu0 %v56_v8  ;;  %122 = vmatpush.xpose.msra.mxu1 %v56_v8 }
  0x31   :  { %78 = vmatpush.xpose.msra.mxu0 %v55_v9  ;;  %123 = vmatpush.xpose.msra.mxu1 %v55_v9 }
  0x35   :  { %79 = vmatpush.xpose.msra.mxu0 %v54_v10  ;;  %124 = vmatpush.xpose.msra.mxu1 %v54_v10 }
  0x39   :  { %80 = vmatpush.xpose.msra.mxu0 %v53_v11  ;;  %125 = vmatpush.xpose.msra.mxu1 %v53_v11 }
  0x3d   :  { %81 = vmatpush.xpose.msra.mxu0 %v52_v12  ;;  %126 = vmatpush.xpose.msra.mxu1 %v52_v12 }
  0x41   :  { %82 = vmatpush.xpose.msra.mxu0 %v51_v13  ;;  %127 = vmatpush.xpose.msra.mxu1 %v51_v13 }
  0x45   :  { %83 = vmatpush.xpose.msra.mxu0 %v50_v14  ;;  %128 = vmatpush.xpose.msra.mxu1 %v50_v14 }
  0x49   :  { %84 = vmatpush.xpose.msra.mxu0 %v49_v15  ;;  %129 = vmatpush.xpose.msra.mxu1 %v49_v15 }
  0x4c   :  { %85 = vmatmul.f32.vlgmr.msra.gmra.mxu0 %v47_v16  ;;  %88 = vmatmul.f32.vlgmr.msra.gmra.mxu1 %v48_v17 }
  0xc9   :  { %v86_v19 = vpop.f32.mrf.mxu0  ;;  %v89_v20 = vpop.f32.mrf.mxu1 }
  0xca   :  { %v87_v21 = vadd.f32 %v135_v18, %v86_v19  ;;  %v90_v22 = vadd.f32 %v135_v18, %v89_v20 }
  0xcc   :  { %92 = vst [vmem:[#allocation7] sm:$0xff] %v87_v21 }
  0xcd   :  { %93 = vst [vmem:[#allocation7 + $0x8] sm:$0xff] %v90_v22 }
  0xce   :  { %106 = dma.vmem_to_hbm [thread:$0]  %s99_s25, 256, %s101_s28, [#allocation4], %s215_s20, %s215_s20, %s216_s21  }
  0xcf   :  { %212 = dma.done.wait [#allocation4], 256  }
  0xd0   :  { %213 = vsyncadd [#allocation4], 4294967040 }
  0xd1   :  { %111 = vsyncpa [#allocation3], 1 }
  0xd2   :  { %112 = vsyncpa [#allocation6], 1 }
  0xd3   :  { %113 = vsyncpa [#allocation4], 1 }

</bundles_post_ra>
